<compile_context>
chip_gen: v7x
topology: tpu7x:2x2x1
jax: 0.10.0
libtpu: 0.0.40
codegen_flags: <defaults>
</compile_context>

<pallas_src>
import functools

import jax
import jax.numpy as jnp
import numpy as np
from jax import lax
from jax.experimental import pallas as pl
from jax.experimental.pallas import tpu as pltpu

EPS = 1e-5
COMPUTE_DTYPE = jnp.bfloat16  # MXU-native conv operands; all accumulation stays f32.


# ----------------------- fixed spatial operators (numpy) -----------------------

def _bilinear_matrix_np(out_size, in_size):
    """PyTorch bilinear align_corners=True interpolation matrix, (out_size, in_size)."""
    if in_size == out_size:
        return np.eye(out_size, dtype=np.float32)
    if out_size == 1:                       # guard: torch picks the first sample
        m = np.zeros((1, in_size), np.float32)
        m[0, 0] = 1.0
        return m
    if in_size == 1:
        return np.ones((out_size, 1), np.float32)
    o = np.arange(out_size, dtype=np.float64)
    src = o * (in_size - 1) / (out_size - 1)
    lo = np.clip(np.floor(src).astype(np.int64), 0, in_size - 2)
    frac = (src - lo).astype(np.float32)
    mat = np.zeros((out_size, in_size), np.float32)
    mat[np.arange(out_size), lo] += 1.0 - frac
    mat[np.arange(out_size), lo + 1] += frac
    return mat


def _up_subsample_kron_np(h, w, hs, ws, stride):
    """kron(B_h, B_w) for (subsample by `stride`) o (bilinear align_corners upsample
    back to (h, w)), acting on the row-major flattened H*W spatial axis."""
    def axis_op(full, sub):
        up = _bilinear_matrix_np(full, sub)            # (full, sub)
        sel = np.zeros((sub, full), np.float32)        # (sub, full) subsample
        sel[np.arange(sub), np.arange(sub) * stride] = 1.0
        return up @ sel                                # (full, full)
    return np.kron(axis_op(h, hs), axis_op(w, ws)).astype(np.float32)


# ------------------------------ parameter folding ------------------------------

def _fold_conv_bn(p):
    """Fold conv bias + eval-mode BatchNorm into (w_t, shift).

    w_t: (Cout, KH*KW*Cin) f32 with the BN scale folded in;
    shift: (Cout,) f32."""
    w, b = p["w"], p["b"]                               # w: (Cout, Cin, KH, KW)
    cout = w.shape[0]
    scale = p["gamma"] / jnp.sqrt(p["var"] + EPS)
    w_t = jnp.transpose(w, (0, 2, 3, 1)).reshape(cout, -1) * scale[:, None]
    shift = (b - p["mean"]) * scale + p["beta"]
    return w_t, shift


def _fold_conv_bn_with_shift_col(p):
    """Like _fold_conv_bn, but the shift is appended as an extra weight column so it
    contracts against a ones-row of the im2col (epilogue becomes just ReLU)."""
    w_t, shift = _fold_conv_bn(p)
    return jnp.concatenate([w_t, shift[:, None]], axis=1).astype(COMPUTE_DTYPE)


# -------------------------------- Pallas kernel --------------------------------

def _make_fused_block_kernel(n_up, n_batch, m, ca, cb):
    """Fully fused forward kernel (single step, batch folded into lanes).

    Ref order:
      refs[0]            cols   (9*Cin+1, N*M)  im2col + ones row (bf16)
      refs[1]            wall   (Ctot, 9*Cin+1) ALL folded conv weights, shift column
      refs[2]            wia    (Cout, Ca)      integration weights for main + level-0
      refs[3+2u], [4+2u] per upsampled level u: bk (M, M) f32, wib (Cout, Cb)
      refs[3+2*n_up]     shint  (Cout, 1)       folded integration shift (f32)
      refs[-1]           out    (Cout, N*M)     lane-dense stores
    """
    def kernel(cols_ref, wall_ref, wia_ref, *rest):
        shint_ref = rest[2 * n_up]
        out_ref = rest[-1]

        cols = cols_ref[...]                                           # (K, N*M)

        # ONE MXU pass for every convolution in the block (main + all branches),
        # shift folded into the contraction, single ReLU epilogue.
        feats = jnp.maximum(
            jnp.dot(wall_ref[...], cols, preferred_element_type=jnp.float32),
            0.0)                                                        # (Ctot, N*M) f32

        # main path + level-0 branch (bilinear upsample at stride 1 is the identity):
        # their 1x1 integration contribution starts the f32 accumulator.
        a = feats[:ca, :].astype(COMPUTE_DTYPE)                         # (Ca, N*M)
        acc = jnp.dot(wia_ref[...], a, preferred_element_type=jnp.float32)

        # strided pyramid branches: per-batch (subsample -> bilinear upsample) Kron
        # operator in f32, then the 1x1 integration contribution, chained into the
        # same f32 accumulator (no concat, no HBM round-trips).
        for u in range(n_up):
            bk = rest[2 * u][...]                                       # (M, M) f32
            wib_ref = rest[2 * u + 1]
            y = feats[ca + u * cb: ca + (u + 1) * cb, :]                # (Cb, N*M) f32
            parts = [
                jnp.dot(y[:, b * m:(b + 1) * m], bk,
                        preferred_element_type=jnp.float32)             # (Cb, M)
                for b in range(n_batch)
            ]
            yk = jnp.concatenate(parts, axis=1).astype(COMPUTE_DTYPE)   # (Cb, N*M)
            acc = acc + jnp.dot(wib_ref[...], yk,
                                preferred_element_type=jnp.float32)

        out_ref[...] = jnp.maximum(acc + shint_ref[...], 0.0).astype(out_ref.dtype)

    return kernel


def _fused_block_call(cols, consts, *, cout, n_up, n_batch, m, ca, cb):
    """Single pallas_call, no grid: everything fits VMEM, one lane-dense step."""
    nm = cols.shape[1]
    n_in = 1 + len(consts)
    return pl.pallas_call(
        _make_fused_block_kernel(n_up, n_batch, m, ca, cb),
        out_shape=jax.ShapeDtypeStruct((cout, nm), jnp.float32),
        in_specs=[pl.BlockSpec(memory_space=pltpu.MemorySpace.VMEM)] * n_in,
        out_specs=pl.BlockSpec(memory_space=pltpu.MemorySpace.VMEM),
        # No vmem_limit_bytes / dimension_semantics: total live VMEM here is ~1.5 MiB,
        # well under every generation's default scoped limit; re-introduce a grid over
        # batch / spatial tiles only once per-step work reaches several microseconds.
    )(cols, *consts)


# --------------------------- module forward (Pallas) ---------------------------

def integrated_conv_bn_act_block(x_nchw, params, levels=3):
    """Forward pass; x_nchw: (N, Cin, H, W) -> (N, out_ch, H, W)."""
    n, cin, h, w = x_nchw.shape
    m = h * w
    # Dense Kron operator is O((H*W)^2); guard it for the intended small-spatial regime.
    assert m <= 1024, "dense Kron spatial operator only intended for small H*W"

    # im2col for the single dense stride-1 3x3 conv, transposed layout with the batch
    # folded into the lane axis: (9*Cin, N*M).  A ones row is appended so the folded
    # conv/BN shift rides the contraction.
    xp = jnp.pad(x_nchw.astype(jnp.float32), ((0, 0), (0, 0), (1, 1), (1, 1)))
    taps = [xp[:, :, ky:ky + h, kx:kx + w] for ky in range(3) for kx in range(3)]
    cols = jnp.stack(taps, axis=1).reshape(n, 9 * cin, m)          # (N, 9*Cin, M)
    cols = jnp.transpose(cols, (1, 0, 2)).reshape(9 * cin, n * m)  # (9*Cin, N*M)
    cols = jnp.concatenate([cols, jnp.ones((1, n * m), jnp.float32)], axis=0)
    cols = cols.astype(COMPUTE_DTYPE)                              # (9*Cin+1, N*M)

    # Fold eval-mode BN + bias into the weights; stack ALL conv weights (main + every
    # pyramid branch) into one matrix so the kernel does a single conv matmul.
    w_stack = [_fold_conv_bn_with_shift_col(params["main"])]
    for i in range(levels):
        w_stack.append(_fold_conv_bn_with_shift_col(params["paths"][i]))
    wall = jnp.concatenate(w_stack, axis=0)                        # (Ctot, 9*Cin+1)

    wi, sh_int = _fold_conv_bn(params["integration"])              # (out_ch, cat_ch)
    out_ch = wi.shape[0]
    cb = params["paths"][0]["w"].shape[0]
    ca = params["main"]["w"].shape[0] + cb                         # main + level-0 branch

    consts = [wall, wi[:, :ca].astype(COMPUTE_DTYPE)]
    n_up = levels - 1
    for i in range(1, levels):
        s = 2 ** i
        hs, ws = (h - 1) // s + 1, (w - 1) // s + 1
        # torch.cat in the module requires the upsampled size to match the input size.
        assert hs * s == h and ws * s == w, "Upsample output must match input size."
        # f32 (precision-sensitive interpolation weights); transposed for y @ bk.
        bk_t = jnp.asarray(_up_subsample_kron_np(h, w, hs, ws, s).T, dtype=jnp.float32)
        wib = wi[:, ca + (i - 1) * cb: ca + i * cb].astype(COMPUTE_DTYPE)
        consts += [bk_t, wib]
    consts.append(sh_int[:, None].astype(jnp.float32))             # (out_ch, 1)

    out = _fused_block_call(cols, consts, cout=out_ch, n_up=n_up,
                            n_batch=n, m=m, ca=ca, cb=cb)          # (out_ch, N*M)
    return jnp.transpose(out.reshape(out_ch, n, h, w), (1, 0, 2, 3))


# ------------------------- parameters (deterministic) --------------------------

def init_conv_bn_params(key, cin, cout, k):
    k1, k2, k3, k4, k5, k6 = jax.random.split(key, 6)
    fan_in = cin * k * k
    return {
        "w": jax.random.normal(k1, (cout, cin, k, k), jnp.float32) / np.sqrt(fan_in),
        "b": jax.random.normal(k2, (cout,), jnp.float32) * 0.1,
        "gamma": jax.random.uniform(k3, (cout,), jnp.float32, 0.5, 1.5),
        "beta": jax.random.normal(k4, (cout,), jnp.float32) * 0.1,
        "mean": jax.random.normal(k5, (cout,), jnp.float32) * 0.1,
        "var": jax.random.uniform(k6, (cout,), jnp.float32, 0.5, 1.5),
    }


def init_params(key, in_ch, out_ch, levels):
    keys = jax.random.split(key, levels + 2)
    branch_ch = out_ch // levels
    return {
        "main": init_conv_bn_params(keys[0], in_ch, out_ch, 3),
        "paths": [init_conv_bn_params(keys[1 + i], in_ch, branch_ch, 3)
                  for i in range(levels)],
        "integration": init_conv_bn_params(
            keys[levels + 1], out_ch + branch_ch * levels, out_ch, 1),
    }


# ---------------------- pure-JAX f32 reference (for checking) ------------------

def reference_forward(x_nchw, params, levels):
    x = jnp.transpose(x_nchw, (0, 2, 3, 1)).astype(jnp.float32)   # NCHW -> NHWC

    def conv_bn_relu(xin, p, stride):
        w_hwio = jnp.transpose(p["w"], (2, 3, 1, 0)).astype(jnp.float32)
        pad = (p["w"].shape[2] - 1) // 2
        y = lax.conv_general_dilated(
            xin, w_hwio, (stride, stride), [(pad, pad), (pad, pad)],
            dimension_numbers=("NHWC", "HWIO", "NHWC"),
            precision=lax.Precision.HIGHEST)
        y = y + p["b"]
        scale = p["gamma"] / jnp.sqrt(p["var"] + EPS)
        y = (y - p["mean"]) * scale + p["beta"]
        return jnp.maximum(y, 0.0)

    feats = [conv_bn_relu(x, params["main"], 1)]
    for i in range(levels):
        s = 2 ** i
        p = conv_bn_relu(x, params["paths"][i], s)
        a_h = jnp.asarray(_bilinear_matrix_np(p.shape[1] * s, p.shape[1]))
        a_w = jnp.asarray(_bilinear_matrix_np(p.shape[2] * s, p.shape[2]))
        p = jnp.einsum("hs,nswc->nhwc", a_h, p, precision=lax.Precision.HIGHEST)
        p = jnp.einsum("wt,nhtc->nhwc", a_w, p, precision=lax.Precision.HIGHEST)
        feats.append(p)
    cat = jnp.concatenate(feats, axis=-1)
    out = conv_bn_relu(cat, params["integration"], 1)
    return jnp.transpose(out, (0, 3, 1, 2))


# ------------------------------------ main -------------------------------------

if __name__ == "__main__":
    key = jax.random.PRNGKey(0)
    k_x, k_p = jax.random.split(key)

    in_ch, out_ch, levels = 4, 6, 3
    n, h, w = 2, 16, 16
    x = jax.random.normal(k_x, (n, in_ch, h, w), jnp.float32)
    params = init_params(k_p, in_ch, out_ch, levels)

    fwd = jax.jit(functools.partial(integrated_conv_bn_act_block, levels=levels))
    out = jax.block_until_ready(fwd(x, params))
    assert out.shape == (n, out_ch, h, w)

    ref = jax.block_until_ready(
        jax.jit(functools.partial(reference_forward, levels=levels))(x, params))
    # bf16 MXU operands with f32 accumulation (f32 interpolation operator): compare at
    # ~1e-2-level tolerance against the f32 HIGHEST-precision reference.
    np.testing.assert_allclose(np.asarray(out), np.asarray(ref),
                               rtol=3e-2, atol=3e-2)

    print("KERNEL_OK")
</pallas_src>

<mosaic_0001>
module attributes {stable_mosaic.version = 11 : i64} {
  func.func @kernel(%arg0: memref<37x512xbf16, #tpu.memory_space<vmem>>, %arg1: memref<12x37xbf16, #tpu.memory_space<vmem>>, %arg2: memref<6x8xbf16, #tpu.memory_space<vmem>>, %arg3: memref<256x256xf32, #tpu.memory_space<vmem>>, %arg4: memref<6x2xbf16, #tpu.memory_space<vmem>>, %arg5: memref<256x256xf32, #tpu.memory_space<vmem>>, %arg6: memref<6x2xbf16, #tpu.memory_space<vmem>>, %arg7: memref<6x1xf32, #tpu.memory_space<vmem>>, %arg8: memref<6x512xf32, #tpu.memory_space<vmem>>) attributes {dimension_semantics = [], scalar_prefetch = 0 : i64, scratch_operands = 0 : i64, tpu.core_type = #tpu.core_type<tc>} {
    %c0 = arith.constant 0 : index
    %c0_0 = arith.constant 0 : index
    %0 = vector.load %arg0[%c0, %c0_0] : memref<37x512xbf16, #tpu.memory_space<vmem>>, vector<37x512xbf16>
    %c0_1 = arith.constant 0 : index
    %c0_2 = arith.constant 0 : index
    %1 = vector.load %arg1[%c0_1, %c0_2] : memref<12x37xbf16, #tpu.memory_space<vmem>>, vector<12x37xbf16>
    %cst = arith.constant dense<0.000000e+00> : vector<12x512xf32>
    %2 = tpu.matmul %1, %0, %cst {dimension_numbers = #tpu.dot_dimension_numbers<[1], [0], [0], [1], [0, 0, 1, 1], [], []>} : vector<12x37xbf16>, vector<37x512xbf16>, vector<12x512xf32> -> vector<12x512xf32>
    %cst_3 = arith.constant 0.000000e+00 : f32
    %3 = vector.broadcast %cst_3 : f32 to vector<12x512xf32>
    %4 = arith.maximumf %2, %3 : vector<12x512xf32>
    %5 = vector.extract_strided_slice %4 {offsets = [0, 0], sizes = [8, 512], strides = [1, 1]} : vector<12x512xf32> to vector<8x512xf32>
    %6 = arith.truncf %5 : vector<8x512xf32> to vector<8x512xbf16>
    %c0_4 = arith.constant 0 : index
    %c0_5 = arith.constant 0 : index
    %7 = vector.load %arg2[%c0_4, %c0_5] : memref<6x8xbf16, #tpu.memory_space<vmem>>, vector<6x8xbf16>
    %cst_6 = arith.constant dense<0.000000e+00> : vector<6x512xf32>
    %8 = tpu.matmul %7, %6, %cst_6 {dimension_numbers = #tpu.dot_dimension_numbers<[1], [0], [0], [1], [0, 0, 1, 1], [], []>} : vector<6x8xbf16>, vector<8x512xbf16>, vector<6x512xf32> -> vector<6x512xf32>
    %c0_7 = arith.constant 0 : index
    %c0_8 = arith.constant 0 : index
    %9 = vector.load %arg3[%c0_7, %c0_8] : memref<256x256xf32, #tpu.memory_space<vmem>>, vector<256x256xf32>
    %10 = vector.extract_strided_slice %4 {offsets = [8, 0], sizes = [2, 512], strides = [1, 1]} : vector<12x512xf32> to vector<2x512xf32>
    %11 = vector.extract_strided_slice %10 {offsets = [0, 0], sizes = [2, 256], strides = [1, 1]} : vector<2x512xf32> to vector<2x256xf32>
    %cst_9 = arith.constant dense<0.000000e+00> : vector<2x256xf32>
    %12 = tpu.matmul %11, %9, %cst_9 {dimension_numbers = #tpu.dot_dimension_numbers<[1], [0], [0], [1], [0, 0, 1, 1], [], []>} : vector<2x256xf32>, vector<256x256xf32>, vector<2x256xf32> -> vector<2x256xf32>
    %13 = vector.extract_strided_slice %10 {offsets = [0, 256], sizes = [2, 256], strides = [1, 1]} : vector<2x512xf32> to vector<2x256xf32>
    %cst_10 = arith.constant dense<0.000000e+00> : vector<2x256xf32>
    %14 = tpu.matmul %13, %9, %cst_10 {dimension_numbers = #tpu.dot_dimension_numbers<[1], [0], [0], [1], [0, 0, 1, 1], [], []>} : vector<2x256xf32>, vector<256x256xf32>, vector<2x256xf32> -> vector<2x256xf32>
    %15 = tpu.concatenate %12, %14 in 1 : vector<2x256xf32>, vector<2x256xf32> -> vector<2x512xf32>
    %16 = arith.truncf %15 : vector<2x512xf32> to vector<2x512xbf16>
    %c0_11 = arith.constant 0 : index
    %c0_12 = arith.constant 0 : index
    %17 = vector.load %arg4[%c0_11, %c0_12] : memref<6x2xbf16, #tpu.memory_space<vmem>>, vector<6x2xbf16>
    %cst_13 = arith.constant dense<0.000000e+00> : vector<6x512xf32>
    %18 = tpu.matmul %17, %16, %cst_13 {dimension_numbers = #tpu.dot_dimension_numbers<[1], [0], [0], [1], [0, 0, 1, 1], [], []>} : vector<6x2xbf16>, vector<2x512xbf16>, vector<6x512xf32> -> vector<6x512xf32>
    %19 = arith.addf %8, %18 : vector<6x512xf32>
    %c0_14 = arith.constant 0 : index
    %c0_15 = arith.constant 0 : index
    %20 = vector.load %arg5[%c0_14, %c0_15] : memref<256x256xf32, #tpu.memory_space<vmem>>, vector<256x256xf32>
    %21 = vector.extract_strided_slice %4 {offsets = [10, 0], sizes = [2, 512], strides = [1, 1]} : vector<12x512xf32> to vector<2x512xf32>
    %22 = vector.extract_strided_slice %21 {offsets = [0, 0], sizes = [2, 256], strides = [1, 1]} : vector<2x512xf32> to vector<2x256xf32>
    %cst_16 = arith.constant dense<0.000000e+00> : vector<2x256xf32>
    %23 = tpu.matmul %22, %20, %cst_16 {dimension_numbers = #tpu.dot_dimension_numbers<[1], [0], [0], [1], [0, 0, 1, 1], [], []>} : vector<2x256xf32>, vector<256x256xf32>, vector<2x256xf32> -> vector<2x256xf32>
    %24 = vector.extract_strided_slice %21 {offsets = [0, 256], sizes = [2, 256], strides = [1, 1]} : vector<2x512xf32> to vector<2x256xf32>
    %cst_17 = arith.constant dense<0.000000e+00> : vector<2x256xf32>
    %25 = tpu.matmul %24, %20, %cst_17 {dimension_numbers = #tpu.dot_dimension_numbers<[1], [0], [0], [1], [0, 0, 1, 1], [], []>} : vector<2x256xf32>, vector<256x256xf32>, vector<2x256xf32> -> vector<2x256xf32>
    %26 = tpu.concatenate %23, %25 in 1 : vector<2x256xf32>, vector<2x256xf32> -> vector<2x512xf32>
    %27 = arith.truncf %26 : vector<2x512xf32> to vector<2x512xbf16>
    %c0_18 = arith.constant 0 : index
    %c0_19 = arith.constant 0 : index
    %28 = vector.load %arg6[%c0_18, %c0_19] : memref<6x2xbf16, #tpu.memory_space<vmem>>, vector<6x2xbf16>
    %cst_20 = arith.constant dense<0.000000e+00> : vector<6x512xf32>
    %29 = tpu.matmul %28, %27, %cst_20 {dimension_numbers = #tpu.dot_dimension_numbers<[1], [0], [0], [1], [0, 0, 1, 1], [], []>} : vector<6x2xbf16>, vector<2x512xbf16>, vector<6x512xf32> -> vector<6x512xf32>
    %30 = arith.addf %19, %29 : vector<6x512xf32>
    %c0_21 = arith.constant 0 : index
    %c0_22 = arith.constant 0 : index
    %31 = vector.load %arg7[%c0_21, %c0_22] : memref<6x1xf32, #tpu.memory_space<vmem>>, vector<6x1xf32>
    %32 = vector.broadcast %31 : vector<6x1xf32> to vector<6x512xf32>
    %33 = arith.addf %30, %32 : vector<6x512xf32>
    %cst_23 = arith.constant 0.000000e+00 : f32
    %34 = vector.broadcast %cst_23 : f32 to vector<6x512xf32>
    %35 = arith.maximumf %33, %34 : vector<6x512xf32>
    %c0_24 = arith.constant 0 : index
    %c0_25 = arith.constant 0 : index
    %36 = vector.load %arg8[%c0_24, %c0_25] : memref<6x512xf32, #tpu.memory_space<vmem>>, vector<6x512xf32>
    tpu.vector_store %arg8[%c0_24, %c0_25], %35 {strides = array<i32>} : memref<6x512xf32, #tpu.memory_space<vmem>>, vector<6x512xf32>,
    return
  }
}

</mosaic_0001>

<bundles_post_ra>
// kernel: integrated_conv_bn_act_block.1
= control target key start
LH: loop header
LB: loop body
LE: loop exit
PB: predicated region body
PF: predicated region fallthrough
CT: control target
= control target key end

     0   :  { %vm101_vm0 = vcmask 1041408   ;;  %v1274_v1 = vmov 0   ;;  %vm102_vm1 = vcmask 1042432   ;;  %v1275_v3 = vmov 65535   ;;  %s1811_s0 = inlined_call_operand.vmem [shape: bf16[37,512], index: 0, kind: input, shape index: {}]   ;;  %s1812_s3 = inlined_call_operand.vmem [shape: f32[256,256], index: 3, kind: input, shape index: {}]   ;;  %s1813_s1 = inlined_call_operand.vmem [shape: bf16[12,37], index: 1, kind: input, shape index: {}]   ;;  %s1814_s5 = inlined_call_operand.vmem [shape: f32[256,256], index: 5, kind: input, shape index: {}]   ;;  %s1815_s4 = inlined_call_operand.vmem [shape: bf16[6,2], index: 4, kind: input, shape index: {}]   ;;  %s1816_s2 = inlined_call_operand.vmem [shape: bf16[6,8], index: 2, kind: input, shape index: {}]   ;;  %s1817_s7 = inlined_call_operand.vmem [shape: f32[6,1], index: 7, kind: input, shape index: {}]   ;;  %s1818_s6 = inlined_call_operand.vmem [shape: bf16[6,2], index: 6, kind: input, shape index: {}]   ;;  %s1819_s8 = inlined_call_operand.vmem [shape: f32[6,512], index: 8, kind: output, shape index: {}]  }
   0x1   :  { %v1257_v0 = vld [vmem:[%s1811_s0 + $0x4] ss:$16 sps:$4 sm:$0xff]   ;;  %149 = vmatprep.mubr.bf16.mxu0 %v1274_v1  ;;  %192 = vmatprep.mubr.bf16.mxu1 %v1274_v1  ;;  %v1259_v2 = vld [vmem:[%s1811_s0 + $0xc] ss:$16 sps:$4 sm:$0xff]   ;;  %v103_v4 = vsel %vm101_vm0, 4294967295, %v1275_v3  ;;  %vm97_vm2 = vcmask 302080  }
   0x2   :  { %1256 = vset.pattern.permute.xlu0 %v1274_v1  ;;  %117 = vmatprep.subr.bf16.mxu0 %v1257_v0  ;;  %v1261_v5 = vld [vmem:[%s1811_s0] ss:$16 sps:$4 sm:$0xff]   ;;  %v1262_v6 = vld [vmem:[%s1811_s0 + $0x8] ss:$16 sps:$4 sm:$0xff]   ;;  %v1263_v7 = vld [vmem:[%s1811_s0 + $0x24] ss:$16 sps:$4 sm:$0xff]  }
   0x3   :  { %160 = vmatprep.subr.bf16.mxu1 %v1259_v2  ;;  %118 = vmatpush1.bf16.msra.mxu0 %v1261_v5  ;;  %v1265_v8 = vld [vmem:[%s1811_s0 + $0x2c] ss:$16 sps:$4 sm:$0xff]   ;;  %v1267_v9 = vld [vmem:[%s1811_s0 + $0x20] ss:$16 sps:$4 sm:$0xff]   ;;  %v104_v10 = vsel %vm102_vm1, %v103_v4, 0  ;;  %vm431_vm3 = vcmask 1040384  }
   0x4   :  { %161 = vmatpush1.bf16.msra.mxu1 %v1262_v6  ;;  %119 = vmatprep.subr.bf16.mxu0 %v1263_v7  ;;  %v1268_v11 = vld [vmem:[%s1811_s0 + $0x28] ss:$16 sps:$4 sm:$0xff]   ;;  %v38_v12 = vld [vmem:[%s1811_s0 + $0x40] sm:$0x77]  ;;  %v218_v26 = vld [vmem:[%s1812_s3 + $0x10] sm:$0xff]  ;;  %vm530_vm4 = vcmask 1043456  }
   0x5   :  { %v39_v13 = vld [vmem:[%s1811_s0 + $0x48] sm:$0x77]  ;;  %162 = vmatprep.subr.bf16.mxu1 %v1265_v8  ;;  %v981_v14 = vcombine.high %v38_v12, %v38_v12  ;;  %v980_v16 = vcombine.low %v38_v12, %v38_v12  ;;  %v219_v19 = vld [vmem:[%s1812_s3 + $0x18] sm:$0xff]  ;;  %v216_v25 = vld [vmem:[%s1812_s3] sm:$0xff]  ;;  %vm427_vm5 = vcmask 15360   ;;  %vm526_vm6 = vcmask 64512  }
   0x6   :  { %v983_v15 = vcombine.high %v39_v13, %v39_v13  ;;  %v982_v17 = vcombine.low %v39_v13, %v39_v13  ;;  %v217_v18 = vld [vmem:[%s1812_s3 + $0x8] sm:$0xff]  ;;  %v223_v28 = vld [vmem:[%s1812_s3 + $0x38] sm:$0xff]  ;;  %v1273_v29 = vld [vmem:[%s1813_s1] sm:$0x3f]   ;;  %v1000_v30 = vpack.c.bf16 %v218_v26, %v216_v25 }
   0x7   :  { %120 = vmatpush1.bf16.msra.mxu0 %v1267_v9  ;;  %v109_v20 = vand.u32 %v981_v14, %v104_v10  ;;  %v106_v22 = vand.u32 %v980_v16, %v104_v10  ;;  %v998_v24 = vpack.c.bf16 %v219_v19, %v217_v18  ;;  %v221_v27 = vld [vmem:[%s1812_s3 + $0x28] sm:$0xff]  ;;  %v220_v32 = vld [vmem:[%s1812_s3 + $0x20] sm:$0xff]  ;;  %v222_v33 = vld [vmem:[%s1812_s3 + $0x30] sm:$0xff] }
   0x8   :  { %163 = vmatpush1.bf16.msra.mxu1 %v1268_v11  ;;  %v115_v21 = vand.u32 %v983_v15, %v104_v10  ;;  %v112_v23 = vand.u32 %v982_v17, %v104_v10  ;;  %v1002_v31 = vpack.c.bf16 %v223_v28, %v221_v27  ;;  %v225_v34 = vld [vmem:[%s1812_s3 + $0x48] sm:$0xff]  ;;  %v227_v35 = vld [vmem:[%s1812_s3 + $0x58] sm:$0xff]  ;;  %v1004_v36 = vpack.c.bf16 %v222_v33, %v220_v32  ;;  %v224_v38 = vld [vmem:[%s1812_s3 + $0x40] sm:$0xff] }
   0x9   :  { %121 = vmatprep.subr.bf16.mxu0 %v109_v20  ;;  %v1006_v37 = vpack.c.bf16 %v227_v35, %v225_v34  ;;  %v226_v39 = vld [vmem:[%s1812_s3 + $0x50] sm:$0xff]  ;;  %v229_v40 = vld [vmem:[%s1812_s3 + $0x68] sm:$0xff]  ;;  %v231_v41 = vld [vmem:[%s1812_s3 + $0x78] sm:$0xff] }
   0xa   :  { %164 = vmatprep.subr.bf16.mxu1 %v115_v21  ;;  %v1008_v42 = vpack.c.bf16 %v226_v39, %v224_v38  ;;  %v1010_v43 = vpack.c.bf16 %v231_v41, %v229_v40  ;;  %v228_v44 = vld [vmem:[%s1812_s3 + $0x60] sm:$0xff]  ;;  %v230_v45 = vld [vmem:[%s1812_s3 + $0x70] sm:$0xff]  ;;  %v233_v46 = vld [vmem:[%s1812_s3 + $0x88] sm:$0xff] }
   0xb   :  { %122 = vmatpush1.bf16.msra.mxu0 %v106_v22  ;;  %v235_v47 = vld [vmem:[%s1812_s3 + $0x98] sm:$0xff]  ;;  %v1012_v48 = vpack.c.bf16 %v230_v45, %v228_v44  ;;  %v232_v50 = vld [vmem:[%s1812_s3 + $0x80] sm:$0xff]  ;;  %v234_v51 = vld [vmem:[%s1812_s3 + $0x90] sm:$0xff] }
   0xc   :  { %165 = vmatpush1.bf16.msra.mxu1 %v112_v23  ;;  %999 = vmatprep.subr.bf16.mxu0 %v998_v24  ;;  %v1014_v49 = vpack.c.bf16 %v235_v47, %v233_v46  ;;  %v237_v52 = vld [vmem:[%s1812_s3 + $0xa8] sm:$0xff]  ;;  %v239_v53 = vld [vmem:[%s1812_s3 + $0xb8] sm:$0xff]  ;;  %v1016_v54 = vpack.c.bf16 %v234_v51, %v232_v50  ;;  %v236_v56 = vld [vmem:[%s1812_s3 + $0xa0] sm:$0xff] }
   0xd   :  { %1063 = vmatprep.subr.bf16.mxu1 %v998_v24  ;;  %v1018_v55 = vpack.c.bf16 %v239_v53, %v237_v52  ;;  %v238_v57 = vld [vmem:[%s1812_s3 + $0xb0] sm:$0xff]  ;;  %v241_v58 = vld [vmem:[%s1812_s3 + $0xc8] sm:$0xff]  ;;  %v243_v59 = vld [vmem:[%s1812_s3 + $0xd8] sm:$0xff] }
   0xe   :  { %984 = vmatmul.mubr.msk.bf16.vlgmr.msra.gmra.mrb[0].mxu0 %vm97_vm2, %v1273_v29  ;;  %v1020_v60 = vpack.c.bf16 %v238_v57, %v236_v56  ;;  %v1022_v61 = vpack.c.bf16 %v243_v59, %v241_v58  ;;  %v240_v62 = vld [vmem:[%s1812_s3 + $0xc0] sm:$0xff]  ;;  %v242_v63 = vld [vmem:[%s1812_s3 + $0xd0] sm:$0xff]  ;;  %v245_v0 = vld [vmem:[%s1812_s3 + $0xe8] sm:$0xff] }
   0xf   :  { %985 = vmatmul.mubr.msk.bf16.vlgmr.msra.gmra.mrb[0].mxu1 %vm97_vm2, %v1273_v29  ;;  %1001 = vmatpush1.bf16.msra.mxu0 %v1000_v30  ;;  %v247_v2 = vld [vmem:[%s1812_s3 + $0xf8] sm:$0xff]  ;;  %v1024_v3 = vpack.c.bf16 %v242_v63, %v240_v62  ;;  %v244_v5 = vld [vmem:[%s1812_s3 + $0xe0] sm:$0xff]  ;;  %v246_v6 = vld [vmem:[%s1812_s3 + $0xf0] sm:$0xff] }
  0x10   :  { %1065 = vmatpush1.bf16.msra.mxu1 %v1000_v30  ;;  %1003 = vmatprep.subr.bf16.mxu0 %v1002_v31  ;;  %v1026_v4 = vpack.c.bf16 %v247_v2, %v245_v0  ;;  %v249_v7 = vld [vmem:[%s1812_s3 + $0x108] sm:$0xff]  ;;  %v251_v8 = vld [vmem:[%s1812_s3 + $0x118] sm:$0xff]  ;;  %v1028_v9 = vpack.c.bf16 %v246_v6, %v244_v5  ;;  %v248_v11 = vld [vmem:[%s1812_s3 + $0x100] sm:$0xff] }
  0x11   :  { %1067 = vmatprep.subr.bf16.mxu1 %v1002_v31  ;;  %v1030_v10 = vpack.c.bf16 %v251_v8, %v249_v7  ;;  %v250_v12 = vld [vmem:[%s1812_s3 + $0x110] sm:$0xff]  ;;  %v253_v13 = vld [vmem:[%s1812_s3 + $0x128] sm:$0xff]  ;;  %v255_v14 = vld [vmem:[%s1812_s3 + $0x138] sm:$0xff] }
  0x12   :  { %v1032_v15 = vpack.c.bf16 %v250_v12, %v248_v11  ;;  %v1034_v16 = vpack.c.bf16 %v255_v14, %v253_v13  ;;  %v252_v17 = vld [vmem:[%s1812_s3 + $0x120] sm:$0xff]  ;;  %v254_v18 = vld [vmem:[%s1812_s3 + $0x130] sm:$0xff]  ;;  %v257_v19 = vld [vmem:[%s1812_s3 + $0x148] sm:$0xff] }
  0x13   :  { %1005 = vmatpush1.bf16.msra.mxu0 %v1004_v36  ;;  %v259_v20 = vld [vmem:[%s1812_s3 + $0x158] sm:$0xff]  ;;  %v1036_v21 = vpack.c.bf16 %v254_v18, %v252_v17  ;;  %v256_v23 = vld [vmem:[%s1812_s3 + $0x140] sm:$0xff]  ;;  %v258_v24 = vld [vmem:[%s1812_s3 + $0x150] sm:$0xff] }
  0x14   :  { %1069 = vmatpush1.bf16.msra.mxu1 %v1004_v36  ;;  %1007 = vmatprep.subr.bf16.mxu0 %v1006_v37  ;;  %v1038_v22 = vpack.c.bf16 %v259_v20, %v257_v19  ;;  %v261_v25 = vld [vmem:[%s1812_s3 + $0x168] sm:$0xff]  ;;  %v263_v26 = vld [vmem:[%s1812_s3 + $0x178] sm:$0xff]  ;;  %v1040_v27 = vpack.c.bf16 %v258_v24, %v256_v23  ;;  %v260_v29 = vld [vmem:[%s1812_s3 + $0x160] sm:$0xff] }
  0x15   :  { %1071 = vmatprep.subr.bf16.mxu1 %v1006_v37  ;;  %v1042_v28 = vpack.c.bf16 %v263_v26, %v261_v25  ;;  %v262_v30 = vld [vmem:[%s1812_s3 + $0x170] sm:$0xff]  ;;  %v265_v31 = vld [vmem:[%s1812_s3 + $0x188] sm:$0xff]  ;;  %v267_v32 = vld [vmem:[%s1812_s3 + $0x198] sm:$0xff] }
  0x16   :  { %v1044_v33 = vpack.c.bf16 %v262_v30, %v260_v29  ;;  %v1046_v34 = vpack.c.bf16 %v267_v32, %v265_v31  ;;  %v264_v35 = vld [vmem:[%s1812_s3 + $0x180] sm:$0xff]  ;;  %v266_v36 = vld [vmem:[%s1812_s3 + $0x190] sm:$0xff]  ;;  %v269_v37 = vld [vmem:[%s1812_s3 + $0x1a8] sm:$0xff] }
  0x17   :  { %1009 = vmatpush1.bf16.msra.mxu0 %v1008_v42  ;;  %v271_v38 = vld [vmem:[%s1812_s3 + $0x1b8] sm:$0xff]  ;;  %v1048_v39 = vpack.c.bf16 %v266_v36, %v264_v35  ;;  %v268_v41 = vld [vmem:[%s1812_s3 + $0x1a0] sm:$0xff]  ;;  %v277_v50 = vld [vmem:[%s1812_s3 + $0x1e8] sm:$0xff] }
  0x18   :  { %1073 = vmatpush1.bf16.msra.mxu1 %v1008_v42  ;;  %1011 = vmatprep.subr.bf16.mxu0 %v1010_v43  ;;  %v1050_v40 = vpack.c.bf16 %v271_v38, %v269_v37  ;;  %v270_v42 = vld [vmem:[%s1812_s3 + $0x1b0] sm:$0xff]  ;;  %v275_v44 = vld [vmem:[%s1812_s3 + $0x1d8] sm:$0xff]  ;;  %v272_v47 = vld [vmem:[%s1812_s3 + $0x1c0] sm:$0xff] }
  0x19   :  { %1075 = vmatprep.subr.bf16.mxu1 %v1010_v43  ;;  %v273_v43 = vld [vmem:[%s1812_s3 + $0x1c8] sm:$0xff]  ;;  %v1052_v45 = vpack.c.bf16 %v270_v42, %v268_v41  ;;  %v279_v51 = vld [vmem:[%s1812_s3 + $0x1f8] sm:$0xff]  ;;  %v276_v53 = vld [vmem:[%s1812_s3 + $0x1e0] sm:$0xff] }
  0x1a   :  { %v1054_v46 = vpack.c.bf16 %v275_v44, %v273_v43  ;;  %v1058_v52 = vpack.c.bf16 %v279_v51, %v277_v50  ;;  %v626_v23 = vld [vmem:[%s1814_s5 + $0x8] sm:$0xff]  ;;  %v628_v24 = vld [vmem:[%s1814_s5 + $0x18] sm:$0xff]  ;;  %v426_v25 = vld [vmem:[%s1815_s4] sm:$0x7] }
  0x1b   :  { %1013 = vmatpush1.bf16.msra.mxu0 %v1012_v48  ;;  %v1126_v26 = vpack.c.bf16 %v628_v24, %v626_v23  ;;  %v625_v29 = vld [vmem:[%s1814_s5] sm:$0xff]  ;;  %v627_v30 = vld [vmem:[%s1814_s5 + $0x10] sm:$0xff]  ;;  %v630_v31 = vld [vmem:[%s1814_s5 + $0x28] sm:$0xff] }
  0x1c   :  { %1077 = vmatpush1.bf16.msra.mxu1 %v1012_v48  ;;  %1015 = vmatprep.subr.bf16.mxu0 %v1014_v49  ;;  %v274_v48 = vld [vmem:[%s1812_s3 + $0x1d0] sm:$0xff]  ;;  %v632_v32 = vld [vmem:[%s1814_s5 + $0x38] sm:$0xff]  ;;  %v629_v35 = vld [vmem:[%s1814_s5 + $0x20] sm:$0xff] }
  0x1d   :  { %1079 = vmatprep.subr.bf16.mxu1 %v1014_v49  ;;  %v1056_v49 = vpack.c.bf16 %v274_v48, %v272_v47  ;;  %v631_v36 = vld [vmem:[%s1814_s5 + $0x30] sm:$0xff]  ;;  %v1130_v37 = vpack.c.bf16 %v632_v32, %v630_v31  ;;  %v634_v38 = vld [vmem:[%s1814_s5 + $0x48] sm:$0xff]  ;;  %v633_v44 = vld [vmem:[%s1814_s5 + $0x40] sm:$0xff] }
  0x1e   :  { %v1132_v42 = vpack.c.bf16 %v631_v36, %v629_v35  ;;  %v640_v47 = vld [vmem:[%s1814_s5 + $0x78] sm:$0xff]  ;;  %v637_v50 = vld [vmem:[%s1814_s5 + $0x60] sm:$0xff]  ;;  %v639_v51 = vld [vmem:[%s1814_s5 + $0x70] sm:$0xff] }
  0x1f   :  { %1017 = vmatpush1.bf16.msra.mxu0 %v1016_v54  ;;  %v662_v23 = vld [vmem:[%s1814_s5 + $0x128] sm:$0xff]  ;;  %v664_v24 = vld [vmem:[%s1814_s5 + $0x138] sm:$0xff] }
  0x20   :  { %1081 = vmatpush1.bf16.msra.mxu1 %v1016_v54  ;;  %1019 = vmatprep.subr.bf16.mxu0 %v1018_v55  ;;  %v278_v54 = vld [vmem:[%s1812_s3 + $0x1f0] sm:$0xff]  ;;  %v670_v35 = vld [vmem:[%s1814_s5 + $0x168] sm:$0xff]  ;;  %v672_v36 = vld [vmem:[%s1814_s5 + $0x178] sm:$0xff] }
  0x21   :  { %1083 = vmatprep.subr.bf16.mxu1 %v1018_v55  ;;  %v1060_v55 = vpack.c.bf16 %v278_v54, %v276_v53  ;;  %v644_v53 = vld [vmem:[%s1814_s5 + $0x98] sm:$0xff]  ;;  %v1140_v54 = vpack.c.bf16 %v639_v51, %v637_v50  ;;  %v677_v51 = vld [vmem:[%s1814_s5 + $0x1a0] sm:$0xff] }
  0x23   :  { %1021 = vmatpush1.bf16.msra.mxu0 %v1020_v60 }
  0x24   :  { %1085 = vmatpush1.bf16.msra.mxu1 %v1020_v60  ;;  %1023 = vmatprep.subr.bf16.mxu0 %v1022_v61 }
  0x25   :  { %1087 = vmatprep.subr.bf16.mxu1 %v1022_v61 }
  0x27   :  { %1025 = vmatpush1.bf16.msra.mxu0 %v1024_v3 }
  0x28   :  { %1089 = vmatpush1.bf16.msra.mxu1 %v1024_v3  ;;  %1027 = vmatprep.subr.bf16.mxu0 %v1026_v4 }
  0x29   :  { %1091 = vmatprep.subr.bf16.mxu1 %v1026_v4 }
  0x2b   :  { %1029 = vmatpush1.bf16.msra.mxu0 %v1028_v9 }
  0x2c   :  { %1093 = vmatpush1.bf16.msra.mxu1 %v1028_v9  ;;  %1031 = vmatprep.subr.bf16.mxu0 %v1030_v10 }
  0x2d   :  { %1095 = vmatprep.subr.bf16.mxu1 %v1030_v10 }
  0x2f   :  { %1033 = vmatpush1.bf16.msra.mxu0 %v1032_v15 }
  0x30   :  { %1097 = vmatpush1.bf16.msra.mxu1 %v1032_v15  ;;  %1035 = vmatprep.subr.bf16.mxu0 %v1034_v16 }
  0x31   :  { %1099 = vmatprep.subr.bf16.mxu1 %v1034_v16 }
  0x33   :  { %1037 = vmatpush1.bf16.msra.mxu0 %v1036_v21 }
  0x34   :  { %1101 = vmatpush1.bf16.msra.mxu1 %v1036_v21  ;;  %1039 = vmatprep.subr.bf16.mxu0 %v1038_v22 }
  0x35   :  { %1103 = vmatprep.subr.bf16.mxu1 %v1038_v22 }
  0x37   :  { %1041 = vmatpush1.bf16.msra.mxu0 %v1040_v27 }
  0x38   :  { %1105 = vmatpush1.bf16.msra.mxu1 %v1040_v27  ;;  %1043 = vmatprep.subr.bf16.mxu0 %v1042_v28 }
  0x39   :  { %1107 = vmatprep.subr.bf16.mxu1 %v1042_v28 }
  0x3b   :  { %1045 = vmatpush1.bf16.msra.mxu0 %v1044_v33 }
  0x3c   :  { %1109 = vmatpush1.bf16.msra.mxu1 %v1044_v33  ;;  %1047 = vmatprep.subr.bf16.mxu0 %v1046_v34  ;;  %v215_v33 = vld [vmem:[%s1816_s2] sm:$0x7] }
  0x3d   :  { %1111 = vmatprep.subr.bf16.mxu1 %v1046_v34  ;;  %v1128_v34 = vpack.c.bf16 %v627_v30, %v625_v29  ;;  %v666_v29 = vld [vmem:[%s1814_s5 + $0x148] sm:$0xff]  ;;  %v668_v30 = vld [vmem:[%s1814_s5 + $0x158] sm:$0xff] }
  0x3e   :  { %v1166_v32 = vpack.c.bf16 %v668_v30, %v666_v29 }
  0x3f   :  { %1049 = vmatpush1.bf16.msra.mxu0 %v1048_v39 }
  0x40   :  { %1113 = vmatpush1.bf16.msra.mxu1 %v1048_v39  ;;  %1051 = vmatprep.subr.bf16.mxu0 %v1050_v40  ;;  %v636_v39 = vld [vmem:[%s1814_s5 + $0x58] sm:$0xff] }
  0x41   :  { %1115 = vmatprep.subr.bf16.mxu1 %v1050_v40  ;;  %v1134_v43 = vpack.c.bf16 %v636_v39, %v634_v38  ;;  %v1170_v38 = vpack.c.bf16 %v672_v36, %v670_v35  ;;  %v669_v39 = vld [vmem:[%s1814_s5 + $0x160] sm:$0xff] }
  0x42   :  { %v847_v35 = vld [vmem:[%s1818_s6] sm:$0x7] }
  0x43   :  { %1053 = vmatpush1.bf16.msra.mxu0 %v1052_v45 }
  0x44   :  { %1117 = vmatpush1.bf16.msra.mxu1 %v1052_v45  ;;  %1055 = vmatprep.subr.bf16.mxu0 %v1054_v46  ;;  %v635_v45 = vld [vmem:[%s1814_s5 + $0x50] sm:$0xff] }
  0x45   :  { %1119 = vmatprep.subr.bf16.mxu1 %v1054_v46  ;;  %v638_v46 = vld [vmem:[%s1814_s5 + $0x68] sm:$0xff]  ;;  %v1136_v48 = vpack.c.bf16 %v635_v45, %v633_v44  ;;  %v673_v45 = vld [vmem:[%s1814_s5 + $0x180] sm:$0xff] }
  0x47   :  { %1057 = vmatpush1.bf16.msra.mxu0 %v1056_v49 }
  0x48   :  { %1121 = vmatpush1.bf16.msra.mxu1 %v1056_v49  ;;  %1059 = vmatprep.subr.bf16.mxu0 %v1058_v52  ;;  %v1138_v49 = vpack.c.bf16 %v640_v47, %v638_v46  ;;  %v675_v46 = vld [vmem:[%s1814_s5 + $0x190] sm:$0xff]  ;;  %v678_v47 = vld [vmem:[%s1814_s5 + $0x1a8] sm:$0xff] }
  0x49   :  { %1123 = vmatprep.subr.bf16.mxu1 %v1058_v52  ;;  %v642_v52 = vld [vmem:[%s1814_s5 + $0x88] sm:$0xff] }
  0x4b   :  { %1061 = vmatpush1.bf16.msra.mxu0 %v1060_v55 }
  0x4c   :  { %1125 = vmatpush1.bf16.msra.mxu1 %v1060_v55  ;;  %v1142_v55 = vpack.c.bf16 %v644_v53, %v642_v52  ;;  %v679_v52 = vld [vmem:[%s1814_s5 + $0x1b0] sm:$0xff]  ;;  %v682_v53 = vld [vmem:[%s1814_s5 + $0x1c8] sm:$0xff] }
  0xe1   :  { %v151_v56 = vpop.f32.mrb[0].mxu0 }
  0xe2   :  { %v194_v57 = vpop.f32.mrb[0].mxu1  ;;  %v153_v58 = vpop.f32.mrb[1].mxu0  ;;  %v203_v5 = vmax.f32 %v151_v56, 0.0  ;;  %v641_v56 = vld [vmem:[%s1814_s5 + $0x80] sm:$0xff] }
  0xe3   :  { %v196_v59 = vpop.f32.mrb[1].mxu1  ;;  %v1549_v60 = vpop.f32.mrb[2].mxu0  ;;  %v205_v6 = vmax.f32 %v194_v57, 0.0  ;;  %v204_v7 = vmax.f32 %v153_v58, 0.0  ;;  %v643_v57 = vld [vmem:[%s1814_s5 + $0x90] sm:$0xff]  ;;  %v646_v58 = vld [vmem:[%s1814_s5 + $0xa8] sm:$0xff] }
  0xe4   :  { %v1551_v61 = vpop.f32.mrb[2].mxu1  ;;  %v1553_v62 = vpop.f32.mrb[3].mxu0  ;;  %v207_v3 = vmax.f32 %v1549_v60, 0.0  ;;  %v206_v8 = vmax.f32 %v196_v59, 0.0  ;;  %v211_v17 = vpack.c.bf16 %v203_v5, %v203_v5  ;;  %v648_v59 = vld [vmem:[%s1814_s5 + $0xb8] sm:$0xff]  ;;  %v650_v5 = vld [vmem:[%s1814_s5 + $0xc8] sm:$0xff] }
  0xe5   :  { %v1555_v63 = vpop.f32.mrb[3].mxu1  ;;  %v208_v0 = vmax.f32 %v1553_v62, 0.0  ;;  %v209_v4 = vmax.f32 %v1551_v61, 0.0  ;;  %v213_v20 = vpack.c.bf16 %v205_v6, %v205_v6  ;;  %v212_v21 = vpack.c.bf16 %v204_v7, %v204_v7  ;;  %v652_v6 = vld [vmem:[%s1814_s5 + $0xd8] sm:$0xff] }
  0xe6   :  { %v210_v2 = vmax.f32 %v1555_v63, 0.0  ;;  %v214_v22 = vpack.c.bf16 %v206_v8, %v206_v8  ;;  %v532_v27 = vsel %vm530_vm4, %v211_v17, 0  ;;  %v1144_v62 = vpack.c.bf16 %v643_v57, %v641_v56  ;;  %v658_v17 = vld [vmem:[%s1814_s5 + $0x108] sm:$0xff]  ;;  %v681_v57 = vld [vmem:[%s1814_s5 + $0x1c0] sm:$0xff] }
  0xe7   :  { %344 = vmatprep.mubr.f32.mxu0 %v208_v0  ;;  %v538_v28 = vsel %vm530_vm4, %v213_v20, 0  ;;  %v692_v40 = vrot.slane %v208_v0, 2  ;;  %v1146_v63 = vpack.c.bf16 %v648_v59, %v646_v58  ;;  %v645_v0 = vld [vmem:[%s1814_s5 + $0xa0] sm:$0xff]  ;;  %v1150_v8 = vpack.c.bf16 %v652_v6, %v650_v5  ;;  %v683_v58 = vld [vmem:[%s1814_s5 + $0x1d0] sm:$0xff]  ;;  %v686_v59 = vld [vmem:[%s1814_s5 + $0x1e8] sm:$0xff] }
  0xe8   :  { %415 = vmatprep.mubr.f32.mxu1 %v210_v2  ;;  %345 = vmatmul.mubr.f32.vlgmr.msra.gmra.mrb[4].mxu0 %v207_v3  ;;  %v769_v41 = vrot.slane %v210_v2, 2  ;;  %v647_v2 = vld [vmem:[%s1814_s5 + $0xb0] sm:$0xff] }
  0xe9   :  { %416 = vmatmul.mubr.f32.vlgmr.msra.gmra.mrb[4].mxu1 %v209_v4  ;;  %476 = vmatprep.mubr.bf16.mxu0 %v1274_v1  ;;  %v1148_v7 = vpack.c.bf16 %v647_v2, %v645_v0  ;;  %v685_v2 = vld [vmem:[%s1814_s5 + $0x1e0] sm:$0xff]  ;;  %v687_v5 = vld [vmem:[%s1814_s5 + $0x1f0] sm:$0xff] }
  0xea   :  { %517 = vmatprep.mubr.bf16.mxu1 %v1274_v1  ;;  %v1188_v6 = vpack.c.bf16 %v687_v5, %v685_v2 }
 0x1bb   :  { %v346_v9 = vpop.f32.mrb[4].mxu0 }
 0x1bc   :  { %v417_v10 = vpop.f32.mrb[4].mxu1  ;;  %v422_v11 = vpack.c.bf16 %v346_v9, %v346_v9  ;;  %v348_v13 = vpop.f32.mrb[5].mxu0  ;;  %v649_v9 = vld [vmem:[%s1814_s5 + $0xc0] sm:$0xff] }
 0x1bd   :  { %v424_v12 = vpack.c.bf16 %v417_v10, %v417_v10  ;;  %v419_v14 = vpop.f32.mrb[5].mxu1  ;;  %v423_v15 = vpack.c.bf16 %v348_v13, %v348_v13  ;;  %v651_v10 = vld [vmem:[%s1814_s5 + $0xd0] sm:$0xff] }
 0x1be   :  { %v425_v16 = vpack.c.bf16 %v419_v14, %v419_v14  ;;  %v433_v18 = vsel %vm431_vm3, %v422_v11, 0  ;;  %v654_v11 = vld [vmem:[%s1814_s5 + $0xe8] sm:$0xff]  ;;  %v1152_v13 = vpack.c.bf16 %v651_v10, %v649_v9  ;;  %v949_v9 = vld [vmem:[%s1817_s7] sm:$0x3f] }
 0x1bf   :  { %v439_v19 = vsel %vm431_vm3, %v424_v12, 0  ;;  %986 = vmatprep.subr.msk.bf16.mxu0 %vm431_vm3, %v423_v15  ;;  %v656_v12 = vld [vmem:[%s1814_s5 + $0xf8] sm:$0xff]  ;;  %v653_v15 = vld [vmem:[%s1814_s5 + $0xe0] sm:$0xff]  ;;  %952 = vperm.xlu0 %1256, %v949_v9  }
 0x1c0   :  { %988 = vmatprep.subr.msk.bf16.mxu1 %vm431_vm3, %v425_v16  ;;  %445 = vmatpush1.bf16.msra.mxu0 %v433_v18  ;;  %v1154_v14 = vpack.c.bf16 %v656_v12, %v654_v11  ;;  %v655_v16 = vld [vmem:[%s1814_s5 + $0xf0] sm:$0xff]  ;;  %v660_v18 = vld [vmem:[%s1814_s5 + $0x118] sm:$0xff] }
 0x1c1   :  { %486 = vmatpush1.bf16.msra.mxu1 %v439_v19  ;;  %990 = vmatprep.subr.msk.bf16.mxu0 %vm530_vm4, %v212_v21  ;;  %v1156_v19 = vpack.c.bf16 %v655_v16, %v653_v15  ;;  %v1158_v20 = vpack.c.bf16 %v660_v18, %v658_v17  ;;  %v657_v21 = vld [vmem:[%s1814_s5 + $0x100] sm:$0xff] }
 0x1c2   :  { %992 = vmatprep.subr.msk.bf16.mxu1 %vm530_vm4, %v214_v22  ;;  %v659_v22 = vld [vmem:[%s1814_s5 + $0x110] sm:$0xff] }
 0x1c3   :  { %987 = vmatmul.mubr.msk.bf16.vlgmr.msra.gmra.mrb[8].mxu0 %vm427_vm5, %v426_v25 }
 0x1c4   :  { %989 = vmatmul.mubr.msk.bf16.vlgmr.msra.gmra.mrb[8].mxu1 %vm427_vm5, %v426_v25  ;;  %544 = vmatpush1.bf16.msra.mxu0 %v532_v27  ;;  %v1160_v25 = vpack.c.bf16 %v659_v22, %v657_v21  ;;  %v661_v27 = vld [vmem:[%s1814_s5 + $0x120] sm:$0xff] }
 0x1c5   :  { %585 = vmatpush1.bf16.msra.mxu1 %v538_v28  ;;  %575 = vmatprep.mubr.bf16.mxu0 %v1274_v1  ;;  %v663_v28 = vld [vmem:[%s1814_s5 + $0x130] sm:$0xff] }
 0x1c6   :  { %616 = vmatprep.mubr.bf16.mxu1 %v1274_v1  ;;  %1127 = vmatprep.subr.bf16.mxu0 %v1126_v26  ;;  %v1164_v31 = vpack.c.bf16 %v663_v28, %v661_v27 }
 0x1c7   :  { %1191 = vmatprep.subr.bf16.mxu1 %v1126_v26  ;;  %v1162_v26 = vpack.c.bf16 %v664_v24, %v662_v23 }
 0x1cb   :  { %991 = vmatmul.mubr.msk.bf16.vlgmr.msra.gmra.mrb[12].mxu0 %vm526_vm6, %v215_v33 }
 0x1cc   :  { %993 = vmatmul.mubr.msk.bf16.vlgmr.msra.gmra.mrb[12].mxu1 %vm526_vm6, %v215_v33  ;;  %1129 = vmatpush1.bf16.msra.mxu0 %v1128_v34  ;;  %v665_v33 = vld [vmem:[%s1814_s5 + $0x140] sm:$0xff] }
 0x1cd   :  { %1193 = vmatpush1.bf16.msra.mxu1 %v1128_v34  ;;  %759 = vmatprep.mubr.f32.mxu0 %v692_v40  ;;  %v667_v34 = vld [vmem:[%s1814_s5 + $0x150] sm:$0xff] }
 0x1ce   :  { %836 = vmatprep.mubr.f32.mxu1 %v769_v41  ;;  %1131 = vmatprep.subr.bf16.mxu0 %v1130_v37  ;;  %v671_v40 = vld [vmem:[%s1814_s5 + $0x170] sm:$0xff]  ;;  %v674_v41 = vld [vmem:[%s1814_s5 + $0x188] sm:$0xff] }
 0x1cf   :  { %1195 = vmatprep.subr.bf16.mxu1 %v1130_v37  ;;  %v1168_v37 = vpack.c.bf16 %v667_v34, %v665_v33 }
 0x1d0   :  { %1133 = vmatpush1.bf16.msra.mxu0 %v1132_v42 }
 0x1d1   :  { %1197 = vmatpush1.bf16.msra.mxu1 %v1132_v42  ;;  %1135 = vmatprep.subr.bf16.mxu0 %v1134_v43  ;;  %v676_v42 = vld [vmem:[%s1814_s5 + $0x198] sm:$0xff] }
 0x1d2   :  { %1199 = vmatprep.subr.bf16.mxu1 %v1134_v43  ;;  %v1172_v43 = vpack.c.bf16 %v671_v40, %v669_v39  ;;  %v1174_v44 = vpack.c.bf16 %v676_v42, %v674_v41 }
 0x1d4   :  { %1137 = vmatpush1.bf16.msra.mxu0 %v1136_v48 }
 0x1d5   :  { %1201 = vmatpush1.bf16.msra.mxu1 %v1136_v48  ;;  %1139 = vmatprep.subr.bf16.mxu0 %v1138_v49  ;;  %v680_v48 = vld [vmem:[%s1814_s5 + $0x1b8] sm:$0xff] }
 0x1d6   :  { %1203 = vmatprep.subr.bf16.mxu1 %v1138_v49  ;;  %v1176_v49 = vpack.c.bf16 %v675_v46, %v673_v45  ;;  %v1178_v50 = vpack.c.bf16 %v680_v48, %v678_v47 }
 0x1d8   :  { %1141 = vmatpush1.bf16.msra.mxu0 %v1140_v54 }
 0x1d9   :  { %1205 = vmatpush1.bf16.msra.mxu1 %v1140_v54  ;;  %1143 = vmatprep.subr.bf16.mxu0 %v1142_v55  ;;  %v684_v54 = vld [vmem:[%s1814_s5 + $0x1d8] sm:$0xff] }
 0x1da   :  { %1207 = vmatprep.subr.bf16.mxu1 %v1142_v55  ;;  %v1180_v55 = vpack.c.bf16 %v679_v52, %v677_v51  ;;  %v1182_v56 = vpack.c.bf16 %v684_v54, %v682_v53 }
 0x1dc   :  { %1145 = vmatpush1.bf16.msra.mxu0 %v1144_v62 }
 0x1dd   :  { %1209 = vmatpush1.bf16.msra.mxu1 %v1144_v62  ;;  %1147 = vmatprep.subr.bf16.mxu0 %v1146_v63  ;;  %v688_v62 = vld [vmem:[%s1814_s5 + $0x1f8] sm:$0xff] }
 0x1de   :  { %1211 = vmatprep.subr.bf16.mxu1 %v1146_v63  ;;  %v1184_v63 = vpack.c.bf16 %v683_v58, %v681_v57  ;;  %v1186_v0 = vpack.c.bf16 %v688_v62, %v686_v59 }
 0x1e0   :  { %1149 = vmatpush1.bf16.msra.mxu0 %v1148_v7 }
 0x1e1   :  { %1213 = vmatpush1.bf16.msra.mxu1 %v1148_v7  ;;  %1151 = vmatprep.subr.bf16.mxu0 %v1150_v8  ;;  %v691_v7 = vrot.slane %v207_v3, 2 }
 0x1e2   :  { %1215 = vmatprep.subr.bf16.mxu1 %v1150_v8  ;;  %v768_v8 = vrot.slane %v209_v4, 2 }
 0x1e4   :  { %1153 = vmatpush1.bf16.msra.mxu0 %v1152_v13 }
 0x1e5   :  { %1217 = vmatpush1.bf16.msra.mxu1 %v1152_v13  ;;  %1155 = vmatprep.subr.bf16.mxu0 %v1154_v14 }
 0x1e6   :  { %1219 = vmatprep.subr.bf16.mxu1 %v1154_v14 }
 0x1e8   :  { %1157 = vmatpush1.bf16.msra.mxu0 %v1156_v19 }
 0x1e9   :  { %1221 = vmatpush1.bf16.msra.mxu1 %v1156_v19  ;;  %1159 = vmatprep.subr.bf16.mxu0 %v1158_v20 }
 0x1ea   :  { %1223 = vmatprep.subr.bf16.mxu1 %v1158_v20 }
 0x1ec   :  { %1161 = vmatpush1.bf16.msra.mxu0 %v1160_v25 }
 0x1ed   :  { %1225 = vmatpush1.bf16.msra.mxu1 %v1160_v25  ;;  %1163 = vmatprep.subr.bf16.mxu0 %v1162_v26 }
 0x1ee   :  { %1227 = vmatprep.subr.bf16.mxu1 %v1162_v26 }
 0x1f0   :  { %1165 = vmatpush1.bf16.msra.mxu0 %v1164_v31 }
 0x1f1   :  { %1229 = vmatpush1.bf16.msra.mxu1 %v1164_v31  ;;  %1167 = vmatprep.subr.bf16.mxu0 %v1166_v32 }
 0x1f2   :  { %1231 = vmatprep.subr.bf16.mxu1 %v1166_v32 }
 0x1f4   :  { %1169 = vmatpush1.bf16.msra.mxu0 %v1168_v37 }
 0x1f5   :  { %1233 = vmatpush1.bf16.msra.mxu1 %v1168_v37  ;;  %1171 = vmatprep.subr.bf16.mxu0 %v1170_v38 }
 0x1f6   :  { %1235 = vmatprep.subr.bf16.mxu1 %v1170_v38 }
 0x1f8   :  { %1173 = vmatpush1.bf16.msra.mxu0 %v1172_v43 }
 0x1f9   :  { %1237 = vmatpush1.bf16.msra.mxu1 %v1172_v43  ;;  %1175 = vmatprep.subr.bf16.mxu0 %v1174_v44 }
 0x1fa   :  { %1239 = vmatprep.subr.bf16.mxu1 %v1174_v44 }
 0x1fc   :  { %1177 = vmatpush1.bf16.msra.mxu0 %v1176_v49 }
 0x1fd   :  { %1241 = vmatpush1.bf16.msra.mxu1 %v1176_v49  ;;  %1179 = vmatprep.subr.bf16.mxu0 %v1178_v50 }
 0x1fe   :  { %1243 = vmatprep.subr.bf16.mxu1 %v1178_v50 }
 0x200   :  { %1181 = vmatpush1.bf16.msra.mxu0 %v1180_v55 }
 0x201   :  { %1245 = vmatpush1.bf16.msra.mxu1 %v1180_v55  ;;  %1183 = vmatprep.subr.bf16.mxu0 %v1182_v56 }
 0x202   :  { %1247 = vmatprep.subr.bf16.mxu1 %v1182_v56 }
 0x204   :  { %1185 = vmatpush1.bf16.msra.mxu0 %v1184_v63 }
 0x205   :  { %1249 = vmatpush1.bf16.msra.mxu1 %v1184_v63  ;;  %1187 = vmatprep.subr.bf16.mxu0 %v1186_v0 }
 0x206   :  { %1251 = vmatprep.subr.bf16.mxu1 %v1186_v0 }
 0x208   :  { %1189 = vmatpush1.bf16.msra.mxu0 %v1188_v6 }
 0x209   :  { %1253 = vmatpush1.bf16.msra.mxu1 %v1188_v6 }
 0x20b   :  { %760 = vmatmul.mubr.f32.vlgmr.msra.gmra.mrb[6].mxu0 %v691_v7 }
 0x20c   :  { %837 = vmatmul.mubr.f32.vlgmr.msra.gmra.mrb[6].mxu1 %v768_v8  ;;  %895 = vmatprep.mubr.bf16.mxu0 %v1274_v1 }
 0x20d   :  { %936 = vmatprep.mubr.bf16.mxu1 %v1274_v1 }
 0x23e   :  { %v953_v36 = vpop.permute.xlu0 %952 }
 0x296   :  { %v478_v10 = vpop.f32.mrb[8].mxu0 }
 0x297   :  { %v519_v11 = vpop.f32.mrb[8].mxu1  ;;  %v480_v12 = vpop.f32.mrb[9].mxu0 }
 0x298   :  { %v521_v13 = vpop.f32.mrb[9].mxu1  ;;  %v482_v60 = vpop.f32.mrb[10].mxu0 }
 0x299   :  { %v523_v3 = vpop.f32.mrb[10].mxu1  ;;  %v483_v14 = vpop.f32.mrb[11].mxu0 }
 0x29a   :  { %v524_v61 = vpop.f32.mrb[11].mxu1 }
 0x29e   :  { %v577_v4 = vpop.f32.mrb[12].mxu0 }
 0x29f   :  { %v618_v15 = vpop.f32.mrb[12].mxu1  ;;  %v578_v16 = vadd.f32 %v577_v4, %v478_v10  ;;  %v579_v18 = vpop.f32.mrb[13].mxu0 }
 0x2a0   :  { %v619_v17 = vadd.f32 %v618_v15, %v519_v11  ;;  %v620_v19 = vpop.f32.mrb[13].mxu1  ;;  %v580_v1 = vadd.f32 %v579_v18, %v480_v12  ;;  %v581_v21 = vpop.f32.mrb[14].mxu0 }
 0x2a1   :  { %v621_v20 = vadd.f32 %v620_v19, %v521_v13  ;;  %v622_v22 = vpop.f32.mrb[14].mxu1  ;;  %v582_v23 = vpop.f32.mrb[15].mxu0 }
 0x2a2   :  { %v623_v24 = vpop.f32.mrb[15].mxu1 }
 0x2de   :  { %v761_v25 = vpop.f32.mrb[6].mxu0 }
 0x2df   :  { %v838_v26 = vpop.f32.mrb[6].mxu1  ;;  %v843_v27 = vpack.c.bf16 %v761_v25, %v761_v25  ;;  %v763_v29 = vpop.f32.mrb[7].mxu0 }
 0x2e0   :  { %v845_v28 = vpack.c.bf16 %v838_v26, %v838_v26  ;;  %v840_v30 = vpop.f32.mrb[7].mxu1  ;;  %v844_v31 = vpack.c.bf16 %v763_v29, %v763_v29 }
 0x2e1   :  { %v846_v32 = vpack.c.bf16 %v840_v30, %v840_v30  ;;  %v852_v33 = vsel %vm431_vm3, %v843_v27, 0 }
 0x2e2   :  { %v858_v34 = vsel %vm431_vm3, %v845_v28, 0  ;;  %994 = vmatprep.subr.msk.bf16.mxu0 %vm431_vm3, %v844_v31 }
 0x2e3   :  { %996 = vmatprep.subr.msk.bf16.mxu1 %vm431_vm3, %v846_v32  ;;  %864 = vmatpush1.bf16.msra.mxu0 %v852_v33 }
 0x2e4   :  { %905 = vmatpush1.bf16.msra.mxu1 %v858_v34 }
 0x2e6   :  { %995 = vmatmul.mubr.msk.bf16.vlgmr.msra.gmra.mrb[16].mxu0 %vm427_vm5, %v847_v35 }
 0x2e7   :  { %997 = vmatmul.mubr.msk.bf16.vlgmr.msra.gmra.mrb[16].mxu1 %vm427_vm5, %v847_v35 }
 0x3b9   :  { %v897_v37 = vpop.f32.mrb[16].mxu0 }
 0x3ba   :  { %v938_v38 = vpop.f32.mrb[16].mxu1  ;;  %v945_v39 = vadd.f32 %v897_v37, %v578_v16  ;;  %v899_v41 = vpop.f32.mrb[17].mxu0 }
 0x3bb   :  { %v947_v40 = vadd.f32 %v938_v38, %v619_v17  ;;  %v940_v42 = vpop.f32.mrb[17].mxu1  ;;  %v946_v43 = vadd.f32 %v899_v41, %v580_v1  ;;  %v901_v45 = vpop.f32.mrb[18].mxu0 }
 0x3bc   :  { %v948_v44 = vadd.f32 %v940_v42, %v621_v20  ;;  %v942_v46 = vpop.f32.mrb[18].mxu1  ;;  %v955_v47 = vadd.f32 %v953_v36, %v945_v39  ;;  %v902_v49 = vpop.f32.mrb[19].mxu0 }
 0x3bd   :  { %v957_v48 = vadd.f32 %v953_v36, %v947_v40  ;;  %v943_v50 = vpop.f32.mrb[19].mxu1  ;;  %v956_v51 = vadd.f32 %v953_v36, %v946_v43 }
 0x3be   :  { %v958_v52 = vadd.f32 %v953_v36, %v948_v44  ;;  %v959_v53 = vmax.f32 %v955_v47, 0.0 }
 0x3bf   :  { %v961_v54 = vmax.f32 %v957_v48, 0.0  ;;  %v960_v55 = vmax.f32 %v956_v51, 0.0 }
 0x3c0   :  { %v962_v56 = vmax.f32 %v958_v52, 0.0  ;;  %963 = vst [vmem:[%s1819_s8] sm:$0x3f] %v959_v53 }
 0x3c1   :  { %965 = vst [vmem:[%s1819_s8 + $0x10] sm:$0x3f] %v961_v54  ;;  %964 = vst [vmem:[%s1819_s8 + $0x8] sm:$0x3f] %v960_v55 }
 0x3c2   :  { %966 = vst [vmem:[%s1819_s8 + $0x18] sm:$0x3f] %v962_v56 }

</bundles_post_ra>
